<compile_context>
chip_gen: v5e
topology: v5e:2x2
jax: 0.10.0
libtpu: 0.0.40
codegen_flags: <defaults>
</compile_context>

<pallas_src>
from functools import partial

import jax
import jax.numpy as jnp
from jax.experimental import pallas as pl
from jax.experimental.pallas import tpu as pltpu


def _round_up(x, m):
    return (x + m - 1) // m * m


def _fused_matmul_kernel(a_ref, w_ref, o_ref):
    # a_ref: (TILE_M, K_pad)  w_ref: (K_pad, N_pad)  o_ref: (TILE_M, N_pad)
    o_ref[...] = jnp.dot(
        a_ref[...], w_ref[...], preferred_element_type=jnp.float32
    ).astype(o_ref.dtype)


def prepare_fused_weight(weight, bias, compute_dtype=jnp.bfloat16):
    """Fold nn.Linear (weight, bias) into one padded (K_pad, N_pad) matrix.

    weight: (out_dim, in_dim)  (PyTorch nn.Linear layout), bias: (out_dim,)
    Row `in_dim` holds the bias (it multiplies the mask column of the
    augmented input). Call once per parameter set (hoisted out of hot path).
    """
    out_dim, in_dim = weight.shape
    k_pad = _round_up(in_dim + 1, 64)     # +1 for the mask/bias column
    n_pad = _round_up(out_dim, 128)       # lane-dense output stores
    wf = jnp.zeros((k_pad, n_pad), jnp.float32)
    wf = wf.at[:in_dim, :out_dim].set(weight.astype(jnp.float32).T)
    wf = wf.at[in_dim, :out_dim].set(bias.astype(jnp.float32))
    return wf.astype(compute_dtype)


@partial(jax.jit, static_argnames=("out_dim", "tile_m", "compute_dtype", "out_dtype"))
def fuse_tm_and_xanes(xanes_feat, tm_info_feat, tm_mask, w_fused, *,
                      out_dim, tile_m=512,
                      compute_dtype=jnp.bfloat16, out_dtype=jnp.float32):
    """
    xanes_feat:   (b, num_TM, xanes_dim)
    tm_info_feat: (b, num_TM, tm_info_dim)
    tm_mask:      (b, num_TM)
    w_fused:      (K_pad, N_pad) from prepare_fused_weight
    returns:      (b, num_TM, out_dim)
    """
    b, num_tm, xanes_dim = xanes_feat.shape
    tm_info_dim = tm_info_feat.shape[-1]
    k_pad, n_pad = w_fused.shape
    M = b * num_tm

    # Augmented operand: [mask*x | mask*t | mask | zeros]  -> (M, K_pad), bf16.
    mask = tm_mask.reshape(M, 1).astype(jnp.float32)
    x = xanes_feat.reshape(M, xanes_dim).astype(jnp.float32) * mask
    t = tm_info_feat.reshape(M, tm_info_dim).astype(jnp.float32) * mask
    pad_cols = k_pad - (xanes_dim + tm_info_dim + 1)
    a = jnp.concatenate(
        [x, t, mask, jnp.zeros((M, pad_cols), jnp.float32)], axis=-1
    ).astype(compute_dtype)

    # Tile the row axis; keep tiles sublane-aligned (multiple of 8).
    tile_m_eff = _round_up(min(tile_m, M), 8)
    m_pad = _round_up(M, tile_m_eff)
    if m_pad != M:
        a = jnp.pad(a, ((0, m_pad - M), (0, 0)))
    grid = (pl.cdiv(m_pad, tile_m_eff),)

    out = pl.pallas_call(
        _fused_matmul_kernel,
        out_shape=jax.ShapeDtypeStruct((m_pad, n_pad), out_dtype),
        grid=grid,
        in_specs=[
            pl.BlockSpec((tile_m_eff, k_pad), lambda i: (i, 0)),   # streamed rows
            pl.BlockSpec((k_pad, n_pad), lambda i: (0, 0)),        # resident weight
        ],
        out_specs=pl.BlockSpec((tile_m_eff, n_pad), lambda i: (i, 0)),
        compiler_params=pltpu.CompilerParams(
            # Row tiles are independent: shard across both TCs on v7x,
            # neutral on v5e/v6e (single TC).
            dimension_semantics=("parallel",),
        ),
    )(a, w_fused)

    return out[:M, :out_dim].reshape(b, num_tm, out_dim)


def _reference(xanes_feat, tm_info_feat, tm_mask, weight, bias):
    fused = jnp.concatenate([xanes_feat, tm_info_feat], axis=-1)
    return (fused @ weight.T + bias) * tm_mask[..., None]


if __name__ == "__main__":
    xanes_dim, tm_info_dim, out_dim = 32, 24, 64
    in_dim = xanes_dim + tm_info_dim

    key = jax.random.PRNGKey(0)
    _, _, _, k4, k5 = jax.random.split(key, 5)

    # Deterministic synthetic nn.Linear params (PyTorch layout + init range).
    bound = 1.0 / jnp.sqrt(in_dim)
    weight = jax.random.uniform(k4, (out_dim, in_dim), jnp.float32, -bound, bound)
    bias = jax.random.uniform(k5, (out_dim,), jnp.float32, -bound, bound)
    w_fused = prepare_fused_weight(weight, bias)   # hoisted: done once

    def run_case(b, num_tm, tile_m):
        kk1, kk2, kk3 = jax.random.split(
            jax.random.fold_in(key, b * 1000 + num_tm), 3)
        xanes_feat = jax.random.normal(kk1, (b, num_tm, xanes_dim), jnp.float32)
        tm_info_feat = jax.random.normal(kk2, (b, num_tm, tm_info_dim), jnp.float32)
        tm_mask = (jax.random.uniform(kk3, (b, num_tm)) > 0.3).astype(jnp.float32)

        out = fuse_tm_and_xanes(xanes_feat, tm_info_feat, tm_mask, w_fused,
                                out_dim=out_dim, tile_m=tile_m)
        out = jax.block_until_ready(out)
        ref = _reference(xanes_feat, tm_info_feat, tm_mask, weight, bias)

        assert out.shape == (b, num_tm, out_dim)
        # bf16 operands / f32 accumulate: loose-ish tolerance vs. f32 reference.
        assert jnp.allclose(out, ref, atol=3e-2, rtol=3e-2), (
            float(jnp.max(jnp.abs(out - ref))))
        # Masked rows must be exactly zero (their augmented rows are all-zero).
        assert bool(jnp.all(jnp.where(tm_mask[..., None] == 0.0, out == 0.0, True)))

    # Small canonical shape (single grid step) ...
    run_case(b=2, num_tm=8, tile_m=512)
    # ... and a larger shape that exercises a multi-step, M-tiled grid.
    run_case(b=4, num_tm=96, tile_m=128)

    print("KERNEL_OK")
</pallas_src>

<mosaic_0001>
module attributes {stable_mosaic.version = 11 : i64} {
  func.func @_fused_matmul_kernel(%arg0: i32, %arg1: memref<16x64xbf16, #tpu.memory_space<vmem>>, %arg2: memref<64x128xbf16, #tpu.memory_space<vmem>>, %arg3: memref<16x128xf32, #tpu.memory_space<vmem>>) attributes {dimension_semantics = [#tpu.dimension_semantics<parallel>], iteration_bounds = array<i64: 1>, scalar_prefetch = 0 : i64, scratch_operands = 0 : i64, tpu.core_type = #tpu.core_type<tc>, window_params = [{transform_indices = @transform_0, window_bounds = array<i64: 16, 64>}, {pipeline_mode = #tpu.pipeline_mode<synchronous>, transform_indices = @transform_1, window_bounds = array<i64: 64, 128>}, {transform_indices = @transform_2, window_bounds = array<i64: 16, 128>}]} {
    %c0 = arith.constant 0 : index
    %c0_0 = arith.constant 0 : index
    %0 = vector.load %arg1[%c0, %c0_0] : memref<16x64xbf16, #tpu.memory_space<vmem>>, vector<16x64xbf16>
    %c0_1 = arith.constant 0 : index
    %c0_2 = arith.constant 0 : index
    %1 = vector.load %arg2[%c0_1, %c0_2] : memref<64x128xbf16, #tpu.memory_space<vmem>>, vector<64x128xbf16>
    %cst = arith.constant dense<0.000000e+00> : vector<16x128xf32>
    %2 = tpu.matmul %0, %1, %cst {dimension_numbers = #tpu.dot_dimension_numbers<[1], [0], [0], [1], [0, 0, 1, 1], [], []>} : vector<16x64xbf16>, vector<64x128xbf16>, vector<16x128xf32> -> vector<16x128xf32>
    %c0_3 = arith.constant 0 : index
    %c0_4 = arith.constant 0 : index
    %3 = vector.load %arg3[%c0_3, %c0_4] : memref<16x128xf32, #tpu.memory_space<vmem>>, vector<16x128xf32>
    tpu.vector_store %arg3[%c0_3, %c0_4], %2 {strides = array<i32>} : memref<16x128xf32, #tpu.memory_space<vmem>>, vector<16x128xf32>,
    return
  }
  func.func @transform_0(%arg0: i32) -> (i32, i32) {
    %c0_i32 = arith.constant 0 : i32
    %c0_i32_0 = arith.constant 0 : i32
    return %arg0, %c0_i32 : i32, i32
  }
  func.func @transform_1(%arg0: i32) -> (i32, i32) {
    %c0_i32 = arith.constant 0 : i32
    %c0_i32_0 = arith.constant 0 : i32
    %c0_i32_1 = arith.constant 0 : i32
    return %c0_i32, %c0_i32_0 : i32, i32
  }
  func.func @transform_2(%arg0: i32) -> (i32, i32) {
    %c0_i32 = arith.constant 0 : i32
    %c0_i32_0 = arith.constant 0 : i32
    return %arg0, %c0_i32 : i32, i32
  }
}

</mosaic_0001>

<bundles_post_ra>
// kernel: mul.9
= control target key start
LH: loop header
LB: loop body
LE: loop exit
PB: predicated region body
PF: predicated region fallthrough
CT: control target
= control target key end

     0   :  { %vm7_vm0 = vcmask 64512   ;;  %vm13_vm1 = vcmask 130112   ;;  %s39_s0 = inlined_call_operand.vmem [shape: f32[2,8], index: 0, kind: input, shape index: {}]   ;;  %s40_s1 = inlined_call_operand.vmem [shape: f32[16], index: 1, kind: output, shape index: {}]  }
   0x1   :  { %v4_v0 = vld [vmem:[%s39_s0] sm:$0x3]  ;;  %s22_s0 = smov 8  }
   0x2   :  { %5 = vst [vmem:[#allocation1] sm:$0x3] %v4_v0 }
   0x9   :  { %v10_v1 = vld [vmem:[#allocation1 + $0x1] sm:$0x1]   ;;  %v6_v2 = vld [vmem:[#allocation1] sm:$0x1]  }
   0xa   :  { %11 = vrot.lane.b32.xlu0 %v10_v1, %s22_s0  ;;  %8 = vst.msk [vmem:[#allocation0] sm:$0x1] %vm7_vm0, %v6_v2  }
  0x7c   :  { %v12_v3 = vpop.permute.xlu0 %11  }
  0x7d   :  { %14 = vst.msk [vmem:[#allocation0] sm:$0x1] %vm13_vm1, %v12_v3  }
  0x84   :  { %v17_v4 = vld [vmem:[#allocation0] sm:$0x1] }
  0x85   :  { %20 = vst [vmem:[%s40_s1] sm:$0x1] %v17_v4 }

// kernel: fuse_tm_and_xanes.1
= control target key start
LH: loop header
LB: loop body
LE: loop exit
PB: predicated region body
PF: predicated region fallthrough
CT: control target
= control target key end

     0   :  { %vm51_vm0 = vcmask 523264   ;;  %s137_s1 = inlined_call_operand.vmem [shape: bf16[64,128], index: 1, kind: input, shape index: {}]   ;;  %s138_s0 = inlined_call_operand.vmem [shape: bf16[16,64], index: 0, kind: input, shape index: {}]   ;;  %s139_s2 = inlined_call_operand.vmem [shape: f32[16,128], index: 2, kind: output, shape index: {}]  }
   0x1   :  { %v100_v0 = vld [vmem:[%s137_s1 + $0x18] sm:$0xff]  ;;  %v99_v1 = vld [vmem:[%s137_s1 + $0x10] sm:$0xff]  ;;  %v98_v2 = vld [vmem:[%s137_s1 + $0x8] sm:$0xff] }
   0x2   :  { %59 = vmatpush.bf16.msra.mxu0 %v100_v0  ;;  %v97_v3 = vld [vmem:[%s137_s1] sm:$0xff] }
   0x3   :  { %v96_v4 = vld [vmem:[%s138_s0] sm:$0xff] }
   0x6   :  { %60 = vmatpush.bf16.msra.mxu0 %v99_v1 }
   0xa   :  { %61 = vmatpush.bf16.msra.mxu0 %v98_v2 }
   0xe   :  { %62 = vmatpush.bf16.msra.mxu0 %v97_v3 }
  0x11   :  { %95 = vmatmul.msk.bf16.vlgmr.msra.gmra.mxu0 %vm51_vm0, %v96_v4 }
  0x8e   :  { %v64_v5 = vpop.f32.mrf.mxu0 }
  0x8f   :  { %69 = vst [vmem:[%s139_s2] sm:$0xff] %v64_v5 }
  0x96   :  { %v66_v6 = vpop.f32.mrf.mxu0 }
  0x97   :  { %70 = vst [vmem:[%s139_s2 + $0x8] sm:$0xff] %v66_v6 }

</bundles_post_ra>
